<compile_context>
chip_gen: v5e
topology: v5e:2x2
jax: 0.10.0
libtpu: 0.0.40
codegen_flags: <defaults>
</compile_context>

<pallas_src>
import jax
import jax.numpy as jnp
from jax.experimental import pallas as pl
from jax.experimental.pallas import tpu as pltpu

_LANE_CANDIDATES = (8192, 4096, 2048, 1024, 512, 256, 128)
_TARGET_TILE_BYTES = 2 * 1024 * 1024  # ~2 MiB per tile


def _identity_kernel(x_ref, o_ref):
    # Pure pass-through: load the tile, store it unchanged.
    o_ref[...] = x_ref[...]


def _sublane_multiple(dtype) -> int:
    # f32 -> 8, bf16/f16 -> 16, int8/fp8 -> 32 (dtype sublane packing).
    itemsize = jnp.dtype(dtype).itemsize
    return {4: 8, 2: 16, 1: 32}.get(itemsize, 8)


def _cost(n_elems, itemsize):
    return pl.CostEstimate(
        flops=0, transcendentals=0, bytes_accessed=2 * n_elems * itemsize
    )


def _copy_2d(x2d):
    """Tiled, lane-dense, software-pipelined Pallas copy of a 2-D slab."""
    rows, lane = x2d.shape
    itemsize = jnp.dtype(x2d.dtype).itemsize
    sub = _sublane_multiple(x2d.dtype)

    # Row tile: ~2 MiB, multiple of the dtype's sublane packing.
    tr = (_TARGET_TILE_BYTES // (lane * itemsize)) // sub * sub
    tr = max(tr, sub)
    if rows <= tr:
        tr = rows  # full-extent block is always legal
    n_tiles = pl.cdiv(rows, tr)

    return pl.pallas_call(
        _identity_kernel,
        out_shape=jax.ShapeDtypeStruct((rows, lane), x2d.dtype),
        grid=(n_tiles,),
        in_specs=[pl.BlockSpec((tr, lane), lambda i: (i, 0))],
        out_specs=pl.BlockSpec((tr, lane), lambda i: (i, 0)),
        # Reuse the input HBM buffer for the output when it is donatable.
        input_output_aliases={0: 0},
        compiler_params=pltpu.CompilerParams(
            # Independent tiles: lets v7x shard the grid across its 2 TCs.
            dimension_semantics=("parallel",),
        ),
        cost_estimate=_cost(rows * lane, itemsize),
    )(x2d)


def _copy_ragged(flat):
    """Copy for totals not divisible by 128: tiled along the lane axis."""
    total = flat.shape[0]
    itemsize = jnp.dtype(flat.dtype).itemsize
    x2d = flat.reshape(1, total)

    # Lane tile ~2 MiB, multiple of 128 (row dim of 1 equals full extent).
    tl = max(128, (_TARGET_TILE_BYTES // itemsize) // 128 * 128)

    if total <= tl:
        # Single full-extent block: always legal, no (8,128) constraint.
        out = pl.pallas_call(
            _identity_kernel,
            out_shape=jax.ShapeDtypeStruct((1, total), flat.dtype),
            input_output_aliases={0: 0},
            cost_estimate=_cost(total, itemsize),
        )(x2d)
        return out.reshape(total)

    n_tiles = pl.cdiv(total, tl)
    out = pl.pallas_call(
        _identity_kernel,
        out_shape=jax.ShapeDtypeStruct((1, total), flat.dtype),
        grid=(n_tiles,),
        in_specs=[pl.BlockSpec((1, tl), lambda i: (0, i))],
        out_specs=pl.BlockSpec((1, tl), lambda i: (0, i)),
        input_output_aliases={0: 0},
        compiler_params=pltpu.CompilerParams(
            dimension_semantics=("parallel",),
        ),
        cost_estimate=_cost(total, itemsize),
    )(x2d)
    return out.reshape(total)


def weight_cast_forward(x):
    """Pallas implementation of weightCast.forward (identity)."""
    # NOTE: the zero-cost implementation of this op is simply `return x`;
    # the kernel below exists because the exercise mandates a Pallas kernel.
    orig_shape = x.shape
    total = x.size
    flat = x.reshape(-1)

    # Pick the widest lane count (multiple of 128) that divides the total,
    # so every vreg lane is used and stores are unmasked.
    lane = None
    for cand in _LANE_CANDIDATES:
        if total % cand == 0:
            lane = cand
            break

    if lane is None:
        # Odd total (not 128-divisible): tiled 1-D copy with a partial
        # trailing block (OOB writes are clipped by the blocked pipeline).
        return _copy_ragged(flat).reshape(orig_shape)

    out2d = _copy_2d(flat.reshape(total // lane, lane))
    return out2d.reshape(orig_shape)


if __name__ == "__main__":
    key = jax.random.PRNGKey(0)
    x = jax.random.normal(key, (2, 4, 16, 16), dtype=jnp.float32)  # NCHW

    y = weight_cast_forward(x)
    jax.block_until_ready(y)

    assert y.shape == x.shape
    assert y.dtype == x.dtype
    assert bool(jnp.all(y == x))

    print("KERNEL_OK")
</pallas_src>

<mosaic_0001>
module attributes {stable_mosaic.version = 11 : i64} {
  func.func @_identity_kernel(%arg0: i32, %arg1: memref<1x2048xf32, #tpu.memory_space<vmem>>, %arg2: memref<1x2048xf32, #tpu.memory_space<vmem>>) attributes {dimension_semantics = [#tpu.dimension_semantics<parallel>], iteration_bounds = array<i64: 1>, scalar_prefetch = 0 : i64, scratch_operands = 0 : i64, tpu.core_type = #tpu.core_type<tc>, window_params = [{transform_indices = @transform_0, window_bounds = array<i64: 1, 2048>}, {transform_indices = @transform_1, window_bounds = array<i64: 1, 2048>}]} {
    %c0 = arith.constant 0 : index
    %c0_0 = arith.constant 0 : index
    %0 = vector.load %arg1[%c0, %c0_0] : memref<1x2048xf32, #tpu.memory_space<vmem>>, vector<1x2048xf32>
    %c0_1 = arith.constant 0 : index
    %c0_2 = arith.constant 0 : index
    %1 = vector.load %arg2[%c0_1, %c0_2] : memref<1x2048xf32, #tpu.memory_space<vmem>>, vector<1x2048xf32>
    tpu.vector_store %arg2[%c0_1, %c0_2], %0 {strides = array<i32>} : memref<1x2048xf32, #tpu.memory_space<vmem>>, vector<1x2048xf32>,
    return
  }
  func.func @transform_0(%arg0: i32) -> (i32, i32) {
    %c0_i32 = arith.constant 0 : i32
    %c0_i32_0 = arith.constant 0 : i32
    return %arg0, %c0_i32 : i32, i32
  }
  func.func @transform_1(%arg0: i32) -> (i32, i32) {
    %c0_i32 = arith.constant 0 : i32
    %c0_i32_0 = arith.constant 0 : i32
    return %arg0, %c0_i32 : i32, i32
  }
}

</mosaic_0001>

<bundles_post_ra>
// kernel: tpu_custom_call.1
= control target key start
LH: loop header
LB: loop body
LE: loop exit
PB: predicated region body
PF: predicated region fallthrough
CT: control target
= control target key end

     0   :  { %6 = vsyncpa [#allocation3], 0  ;;  %s116_s0 = inlined_call_operand.hbm [shape: f32[1,2048], index: 0, kind: input, shape index: {}, may-alias: {0,1}]   ;;  %s117_s1 = inlined_call_operand.hbm [shape: f32[1,2048], index: 1, kind: output, shape index: {}, may-alias: {0,1}]  }
   0x1   :  { %7 = vsyncpa [#allocation4], 0  ;;  %s13_s8 = sshll.u32 %s116_s0, 4  ;;  %s98_s9 = smov [#allocation2]   ;;  %s14_s8 = int_to_ptr.hbm [resolvable:$true] %s13_s8 }
   0x2   :  { %s15_s10 = sshll.u32 %s98_s9, 4  ;;  %s16_s10 = int_to_ptr.vmem [resolvable:$true] %s15_s10 }
   0x3   :  { %18 = dma.hbm_to_vmem [thread:$0]  %s14_s8, 256, %s16_s10, [#allocation3]  }
   0x4   :  { %94 = dma.done.wait [#allocation3], 256  }
   0x5   :  { %95 = vsyncadd [#allocation3], 4294967040  ;;  %s99_s11 = smov [#allocation5]   ;;  %s34_s15 = sshll.u32 %s117_s1, 4  ;;  %v23_v0 = vld [vmem:[#allocation2] sm:$0xff]  ;;  %v24_v1 = vld [vmem:[#allocation2 + $0x8] sm:$0xff]  ;;  %s35_s15 = int_to_ptr.hbm [resolvable:$true] %s34_s15 }
   0x6   :  { %s32_s12 = sshll.u32 %s99_s11, 4  ;;  %25 = vst [vmem:[#allocation5] sm:$0xff] %v23_v0  ;;  %s33_s12 = int_to_ptr.vmem [resolvable:$true] %s32_s12 }
   0x7   :  { %26 = vst [vmem:[#allocation5 + $0x8] sm:$0xff] %v24_v1 }
   0x8   :  { %37 = dma.vmem_to_hbm [thread:$0]  %s33_s12, 256, %s35_s15, [#allocation4]  }
   0x9   :  { %96 = dma.done.wait [#allocation4], 256  }
   0xa   :  { %97 = vsyncadd [#allocation4], 4294967040 }
   0xb   :  { %42 = vsyncpa [#allocation3], 1 }
   0xc   :  { %43 = vsyncpa [#allocation4], 1 }

</bundles_post_ra>
